<compile_context>
chip_gen: v7x
topology: tpu7x:2x2x1
jax: 0.10.0
libtpu: 0.0.40
codegen_flags: <defaults>
</compile_context>

<pallas_src>
import numpy as np
import jax
import jax.numpy as jnp
from jax.experimental import pallas as pl
from jax.experimental.pallas import tpu as pltpu


# ----------------------------- Pallas kernel ------------------------------ #

def cmf_forward_kernel(u_ref, i_ref, o_ref):
    # u_ref, i_ref : (D, tb) VMEM tiles, batch on lanes; o_ref : (1, tb).
    # VPU multiply, short sublane-axis accumulate, sigmoid via EUP.
    prod = u_ref[...] * i_ref[...]                       # inputs already f32
    s = jnp.sum(prod, axis=0, keepdims=True)             # (1, tb), lane-dense
    o_ref[...] = jax.nn.sigmoid(s)


def _round_up(n, m):
    return ((n + m - 1) // m) * m


def cmf_forward_emb_pallas(user_e, item_e, tb=None, vmem_limit_bytes=32 << 20):
    """sigmoid(sum_d(user_e * item_e)) computed by a Pallas TPU kernel.

    user_e, item_e : (B, D) float32.  Internally transposed to (D, B_pad) so
    the batch occupies full 128-lane vregs, the reduction is a sublane
    accumulate, and the output is a lane-dense (1, tb) row per grid step.
    """
    B, D = user_e.shape
    assert item_e.shape == (B, D)

    # --- pick a lane-aligned batch tile (large, but 128-aligned) ---------- #
    if tb is None:
        tb = min(2048, _round_up(B, 128))
    assert tb % 128 == 0, "batch tile must be a multiple of 128 (lane width)"

    # Cap the tile by an explicit VMEM budget so the same tiling is safe on
    # v5e (16 MiB default scoped), v6e (32/128 MiB) and v7x (32/64 MiB):
    # 2 inputs x 2 pipeline buffers x D x 4B + 2 output buffers x 4B per col.
    bytes_per_col = 2 * 2 * D * 4 + 2 * 4
    max_tb = max(128, ((vmem_limit_bytes // 2) // bytes_per_col) // 128 * 128)
    tb = min(tb, max_tb)

    B_pad = _round_up(B, tb)
    pad = B_pad - B

    # Batch on lanes: (D, B_pad); zero-pad the tail (sliced off below).
    u_t = jnp.pad(user_e.T.astype(jnp.float32), ((0, 0), (0, pad)))
    i_t = jnp.pad(item_e.T.astype(jnp.float32), ((0, 0), (0, pad)))

    out = pl.pallas_call(
        cmf_forward_kernel,
        out_shape=jax.ShapeDtypeStruct((1, B_pad), jnp.float32),
        grid_spec=pltpu.PrefetchScalarGridSpec(
            num_scalar_prefetch=0,
            grid=(B_pad // tb,),
            in_specs=[
                pl.BlockSpec((D, tb), lambda i: (0, i)),
                pl.BlockSpec((D, tb), lambda i: (0, i)),
            ],
            out_specs=pl.BlockSpec((1, tb), lambda i: (0, i)),
        ),
        compiler_params=pltpu.CompilerParams(
            dimension_semantics=("parallel",),       # shards batch over 2 TCs on v7x
            vmem_limit_bytes=vmem_limit_bytes),
    )(u_t, i_t)
    return out[0, :B]                                # (B,)


# --------------------------- parameter setup ------------------------------ #

def _xavier_uniform(key, shape):
    fan_in, fan_out = shape
    limit = float(np.sqrt(6.0 / (fan_in + fan_out)))
    return jax.random.uniform(key, shape, jnp.float32, -limit, limit)


def init_cmf_params(key, field_dims, embed_dim):
    """Matches CMF.__init__: user table (field_dims[0], embed_dim*(F-1)),
    item table (sum(field_dims[1:]), embed_dim)."""
    num_item_fields = len(field_dims) - 1
    user_dim = embed_dim * num_item_fields
    k_u, k_i = jax.random.split(key)
    user_table = _xavier_uniform(k_u, (field_dims[0], user_dim))
    item_table = _xavier_uniform(k_i, (int(sum(field_dims[1:])), embed_dim))
    item_offsets = jnp.asarray(
        np.concatenate([[0], np.cumsum(field_dims[1:])[:-1]]), dtype=jnp.int32)
    return user_table, item_table, item_offsets


def cmf_forward(x, user_table, item_table, item_offsets):
    """Full CMF.forward: embedding lookups in JAX, hot path in Pallas."""
    B = x.shape[0]
    # TODO(synk): fuse these gathers into the pallas_call (scalar-prefetch ids
    # + manual DMA) to avoid round-tripping user_e/item_e through HBM; with
    # embed_dim*4-byte rows the per-row DMAs are tiny, so it only pays off at
    # larger embed_dim / batch.
    user_e = jnp.take(user_table, x[:, 0], axis=0)                       # (B, D)
    item_idx = x[:, 1:] + item_offsets[None, :]                          # (B, F-1)
    item_e = jnp.take(item_table, item_idx, axis=0).reshape(B, -1)       # (B, D)
    return cmf_forward_emb_pallas(user_e, item_e)


# --------------------------------- main ------------------------------------ #

if __name__ == "__main__":
    # field_dims: [n_users, item_field_1, item_field_2, item_field_3]
    field_dims = [50, 20, 30, 10]
    embed_dim = 16
    B = 8

    key = jax.random.PRNGKey(0)
    kp, kx = jax.random.split(key)
    user_table, item_table, item_offsets = init_cmf_params(kp, field_dims, embed_dim)

    # Integer feature indices x: (B, num_fields); column f in [0, field_dims[f])
    cols = []
    for f, dim in enumerate(field_dims):
        kx, kc = jax.random.split(kx)
        cols.append(jax.random.randint(kc, (B, 1), 0, dim, dtype=jnp.int32))
    x = jnp.concatenate(cols, axis=1)                                    # (B, 4)

    out = cmf_forward(x, user_table, item_table, item_offsets)
    out = jax.block_until_ready(out)

    # Pure-JAX reference check of the forward semantics.
    user_e_ref = jnp.take(user_table, x[:, 0], axis=0)
    item_e_ref = jnp.take(item_table, x[:, 1:] + item_offsets[None, :],
                          axis=0).reshape(B, -1)
    ref = jax.nn.sigmoid(jnp.sum(user_e_ref * item_e_ref, axis=1))
    assert out.shape == (B,)
    np.testing.assert_allclose(np.asarray(out), np.asarray(ref),
                               rtol=1e-5, atol=1e-6)

    print("KERNEL_OK")
</pallas_src>

<mosaic_0001>
module attributes {stable_mosaic.version = 11 : i64} {
  func.func @cmf_forward_kernel(%arg0: i32, %arg1: memref<48x128xf32, #tpu.memory_space<vmem>>, %arg2: memref<48x128xf32, #tpu.memory_space<vmem>>, %arg3: memref<1x128xf32, #tpu.memory_space<vmem>>) attributes {dimension_semantics = [#tpu.dimension_semantics<parallel>], iteration_bounds = array<i64: 1>, scalar_prefetch = 0 : i64, scratch_operands = 0 : i64, tpu.core_type = #tpu.core_type<tc>, window_params = [{transform_indices = @transform_0, window_bounds = array<i64: 48, 128>}, {transform_indices = @transform_1, window_bounds = array<i64: 48, 128>}, {transform_indices = @transform_2, window_bounds = array<i64: 1, 128>}]} {
    %c0 = arith.constant 0 : index
    %c0_0 = arith.constant 0 : index
    %0 = vector.load %arg1[%c0, %c0_0] : memref<48x128xf32, #tpu.memory_space<vmem>>, vector<48x128xf32>
    %c0_1 = arith.constant 0 : index
    %c0_2 = arith.constant 0 : index
    %1 = vector.load %arg2[%c0_1, %c0_2] : memref<48x128xf32, #tpu.memory_space<vmem>>, vector<48x128xf32>
    %2 = arith.mulf %0, %1 : vector<48x128xf32>
    %cst = arith.constant dense<0.000000e+00> : vector<128xf32>
    %3 = vector.multi_reduction <add>, %2, %cst [0] : vector<48x128xf32> to vector<128xf32>
    %4 = vector.shape_cast %3 : vector<128xf32> to vector<1x128xf32>
    %5 = arith.negf %4 : vector<1x128xf32>
    %6 = math.exp %5 : vector<1x128xf32>
    %cst_3 = arith.constant 1.000000e+00 : f32
    %7 = vector.broadcast %cst_3 : f32 to vector<1x128xf32>
    %8 = arith.addf %7, %6 : vector<1x128xf32>
    %9 = arith.divf %7, %8 : vector<1x128xf32>
    %c0_4 = arith.constant 0 : index
    %c0_5 = arith.constant 0 : index
    %10 = vector.load %arg3[%c0_4, %c0_5] : memref<1x128xf32, #tpu.memory_space<vmem>>, vector<1x128xf32>
    tpu.vector_store %arg3[%c0_4, %c0_5], %9 {strides = array<i32>} : memref<1x128xf32, #tpu.memory_space<vmem>>, vector<1x128xf32>,
    return
  }
  func.func @transform_0(%arg0: i32) -> (i32, i32) {
    %c0_i32 = arith.constant 0 : i32
    %c0_i32_0 = arith.constant 0 : i32
    return %c0_i32, %arg0 : i32, i32
  }
  func.func @transform_1(%arg0: i32) -> (i32, i32) {
    %c0_i32 = arith.constant 0 : i32
    %c0_i32_0 = arith.constant 0 : i32
    return %c0_i32, %arg0 : i32, i32
  }
  func.func @transform_2(%arg0: i32) -> (i32, i32) {
    %c0_i32 = arith.constant 0 : i32
    %c0_i32_0 = arith.constant 0 : i32
    return %c0_i32, %arg0 : i32, i32
  }
}

</mosaic_0001>

<bundles_post_ra>
// kernel: tpu_custom_call.1
= control target key start
LH: loop header
LB: loop body
LE: loop exit
PB: predicated region body
PF: predicated region fallthrough
CT: control target
= control target key end

     0   :  { %7 = vsyncpa [#allocation3], 0  ;;  %s230_s0 = inlined_call_operand.hbm [shape: f32[48,128], index: 0, kind: input, shape index: {}]   ;;  %s231_s1 = inlined_call_operand.hbm [shape: f32[48,128], index: 1, kind: input, shape index: {}]   ;;  %s232_s2 = inlined_call_operand.hbm [shape: f32[1,128], index: 2, kind: output, shape index: {}]  }
   0x1   :  { %8 = vsyncpa [#allocation6], 0 }
   0x2   :  { %9 = vsyncpa [#allocation4], 0  ;;  %s174_s9 = smov [#allocation2]   ;;  %s102_s13 = scalar_lea.hbm %s230_s0, 768 }
   0x3   :  { %s15_s10 = sshll.u32 %s174_s9, 4  ;;  %p103_p0 = scmp.ne.s32.totalorder %s230_s0, %s102_s13  ;;  %s16_s10 = int_to_ptr.vmem [resolvable:$true] %s15_s10 }
   0x4   :  { %p106_p1 = scmp.lt.u32.totalorder %s102_s13, %s230_s0 }
   0x6   :  { %p108_p2 = pnand %p106_p1, %p103_p0 }
   0x8   :  { %111 = shalt.err (!%p108_p2)
}
   0x9   :  { %s112_s18 = scalar_lea.vmem %s16_s10, 768  ;;  %p117_p4 = scmp.lt.s32.totalorder %s16_s10, %s16_s10 }
   0xa   :  { %p113_p3 = scmp.ne.s32.totalorder %s16_s10, %s112_s18  ;;  %p118_p5 = scmp.lt.s32.totalorder %s112_s18, %s112_s18 }
   0xc   :  { %p119_p6 = por %p118_p5, %p117_p4 }
   0xe   :  { %p120_p7 = pnand %p119_p6, %p113_p3 }
  0x10   :  { %123 = shalt.err (!%p120_p7)
}
  0x11   :  { %s175_s19 = smov 128   ;;  %s176_s20 = smov 8  }
  0x12   :  { %21 = dma.hbm_to_vmem [thread:$0]  %s230_s0, 768, %s16_s10, [#allocation3], %s175_s19, %s175_s19, %s176_s20  }
  0x13   :  { %s177_s23 = smov [#allocation5]   ;;  %s124_s27 = scalar_lea.hbm %s231_s1, 768 }
  0x14   :  { %s27_s24 = sshll.u32 %s177_s23, 4  ;;  %p125_p8 = scmp.ne.s32.totalorder %s231_s1, %s124_s27  ;;  %s28_s24 = int_to_ptr.vmem [resolvable:$true] %s27_s24 }
  0x15   :  { %p128_p9 = scmp.lt.u32.totalorder %s124_s27, %s231_s1 }
  0x17   :  { %p130_p10 = pnand %p128_p9, %p125_p8 }
  0x19   :  { %133 = shalt.err (!%p130_p10)
}
  0x1a   :  { %s134_s4 = scalar_lea.vmem %s28_s24, 768  ;;  %p139_p12 = scmp.lt.s32.totalorder %s28_s24, %s28_s24 }
  0x1b   :  { %p135_p11 = scmp.ne.s32.totalorder %s28_s24, %s134_s4  ;;  %p140_p13 = scmp.lt.s32.totalorder %s134_s4, %s134_s4 }
  0x1d   :  { %p141_p0 = por %p140_p13, %p139_p12 }
  0x1f   :  { %p142_p1 = pnand %p141_p0, %p135_p11 }
  0x21   :  { %145 = shalt.err (!%p142_p1)
}
  0x22   :  { %33 = dma.hbm_to_vmem [thread:$0]  %s231_s1, 768, %s28_s24, [#allocation6], %s175_s19, %s175_s19, %s176_s20  }
  0x23   :  { %168 = dma.done.wait [#allocation3], 768  }
  0x24   :  { %169 = vsyncadd [#allocation3], 4294966528 }
  0x25   :  { %170 = dma.done.wait [#allocation6], 768  }
  0x26   :  { %171 = vsyncadd [#allocation6], 4294966528  ;;  %v40_v0 = vld [vmem:[#allocation2] sm:$0xff]  ;;  %v41_v1 = vld [vmem:[#allocation2 + $0x8] sm:$0xff]  ;;  %s178_s1 = smov [#allocation7]  }
  0x27   :  { %v42_v2 = vld [vmem:[#allocation2 + $0x10] sm:$0xff]  ;;  %v43_v3 = vld [vmem:[#allocation2 + $0x18] sm:$0xff]  ;;  %v48_v6 = vld [vmem:[#allocation5 + $0x10] sm:$0xff]  ;;  %s82_s6 = sshll.u32 %s178_s1, 4  ;;  %s83_s6 = int_to_ptr.vmem [resolvable:$true] %s82_s6 }
  0x28   :  { %v46_v4 = vld [vmem:[#allocation5] sm:$0xff]  ;;  %v47_v5 = vld [vmem:[#allocation5 + $0x8] sm:$0xff]  ;;  %v49_v7 = vld [vmem:[#allocation5 + $0x18] sm:$0xff]  ;;  %v54_v10 = vmul.f32 %v48_v6, %v42_v2  ;;  %s146_s7 = scalar_lea.vmem %s83_s6, 16  ;;  %s150_s8 = scalar_lea.vmem %s83_s6, 32 }
  0x29   :  { %v52_v8 = vmul.f32 %v46_v4, %v40_v0  ;;  %v53_v9 = vmul.f32 %v47_v5, %v41_v1  ;;  %v44_v11 = vld [vmem:[#allocation2 + $0x20] sm:$0xff]  ;;  %v50_v12 = vld [vmem:[#allocation5 + $0x20] sm:$0xff]  ;;  %v55_v13 = vmul.f32 %v49_v7, %v43_v3  ;;  %v45_v15 = vld [vmem:[#allocation2 + $0x28] sm:$0xff]  ;;  %p147_p2 = scmp.ne.s32.totalorder %s83_s6, %s146_s7  ;;  %p151_p3 = scmp.lt.s32.totalorder %s83_s6, %s83_s6 }
  0x2a   :  { %v51_v16 = vld [vmem:[#allocation5 + $0x28] sm:$0xff]  ;;  %v56_v17 = vmul.f32 %v50_v12, %v44_v11  ;;  %p152_p4 = scmp.lt.s32.totalorder %s150_s8, %s146_s7 }
  0x2b   :  { %v58_v14 = vadd.f32 %v53_v9, %v52_v8  ;;  %v57_v19 = vmul.f32 %v51_v16, %v45_v15 }
  0x2c   :  { %p153_p5 = por %p152_p4, %p151_p3 }
  0x2d   :  { %v59_v18 = vadd.f32 %v58_v14, %v54_v10 }
  0x2e   :  { %p154_p6 = pnand %p153_p5, %p147_p2 }
  0x2f   :  { %v60_v20 = vadd.f32 %v59_v18, %v55_v13 }
  0x31   :  { %v61_v21 = vadd.f32 %v60_v20, %v56_v17 }
  0x33   :  { %v62_v22 = vadd.f32 %v61_v21, %v57_v19 }
  0x35   :  { %v63_v23 = vrot.slane %v62_v22, 4 }
  0x37   :  { %v64_v24 = vadd.f32 %v63_v23, %v62_v22 }
  0x39   :  { %v65_v25 = vrot.slane %v64_v24, 2 }
  0x3b   :  { %v66_v26 = vadd.f32 %v65_v25, %v64_v24 }
  0x3d   :  { %v67_v27 = vrot.slane %v66_v26, 1 }
  0x3f   :  { %v68_v28 = vadd.f32 %v67_v27, %v66_v26 }
  0x41   :  { %v92_v29 = vmul.f32 -1.442695, %v68_v28 }
  0x43   :  { %98 = vpow2.f32 %v92_v29 }
  0x4d   :  { %v99_v30 = vpop.eup %98 }
  0x4e   :  { %v72_v31 = vadd.f32 1.0, %v99_v30 }
  0x50   :  { %100 = vrcp.f32 %v72_v31 }
  0x5a   :  { %v101_v32 = vpop.eup %100 }
  0x5b   :  { %75 = vst [vmem:[#allocation7] sm:$0x1] %v101_v32 }
  0x5c   :  { %157 = shalt.err (!%p154_p6)
}
  0x5d   :  { %s158_s11 = scalar_lea.hbm %s232_s2, 16 }
  0x5e   :  { %p159_p7 = scmp.ne.s32.totalorder %s232_s2, %s158_s11  ;;  %p162_p8 = scmp.lt.u32.totalorder %s158_s11, %s232_s2 }
  0x60   :  { %p164_p9 = pnand %p162_p8, %p159_p7 }
  0x62   :  { %167 = shalt.err (!%p164_p9)
}
  0x63   :  { %85 = dma.vmem_to_hbm [thread:$0]  %s83_s6, 16, %s232_s2, [#allocation4]  }
  0x64   :  { %172 = dma.done.wait [#allocation4], 16  }
  0x65   :  { %173 = vsyncadd [#allocation4], 4294967280 }
  0x66   :  { %89 = vsyncpa [#allocation3], 1 }
  0x67   :  { %90 = vsyncpa [#allocation6], 1 }
  0x68   :  { %91 = vsyncpa [#allocation4], 1 }

</bundles_post_ra>
